<compile_context>
chip_gen: v5e
topology: v5e:2x2
jax: 0.10.0
libtpu: 0.0.40
codegen_flags: <defaults>
</compile_context>

<pallas_src>
import jax
import jax.numpy as jnp
from jax.experimental import pallas as pl
from jax.experimental.pallas import tpu as pltpu


def _mlp_kernel(x_ref, w1_ref, b1_ref, w2_ref, b2_ref, o_ref):
    # Cast x to the weight/compute dtype in VMEM (no HBM cost); MXU matmuls
    # accumulate in f32; bias add + ReLU stay f32 on the VPU (mem-bound
    # kernel, so VPU slack is free).
    x = x_ref[...].astype(w1_ref.dtype)
    h = jnp.dot(x, w1_ref[...], preferred_element_type=jnp.float32)
    h = jnp.maximum(h + b1_ref[...], 0.0)                    # (tm, H) + (1, H)
    o = jnp.dot(h.astype(w2_ref.dtype), w2_ref[...],
                preferred_element_type=jnp.float32)
    o_ref[...] = (o + b2_ref[...]).astype(o_ref.dtype)


def _round_up(x, m):
    return ((x + m - 1) // m) * m


def _cdiv(a, b):
    return (a + b - 1) // b


def _chip_params():
    """Generation-aware knobs.  v7x: 2 TCs/chip, ~3.2 TB/s HBM, 64 MiB VMEM
    -> bigger row tiles + cross-TC split.  v5e/v6e: 1 TC, 128 MiB VMEM."""
    try:
        kind = jax.devices()[0].device_kind.lower()
    except Exception:
        kind = ""
    if "7" in kind:
        return dict(row_target=4096, num_tc=2, vmem_soft_cap=48 << 20)
    return dict(row_target=1024, num_tc=1, vmem_soft_cap=96 << 20)


def _choose_tm(m, sublane, row_target, num_tc, traffic_bytes_per_row):
    """Row tile: as large as `row_target` (amortizes ~0.35us/step overhead),
    split across TensorCores only when there is enough DMA traffic for the
    split to pay (>= ~512 KiB per core), and balanced so the last tile is
    not nearly empty (e.g. M=1040 with target 1024 becomes 2x~520, not
    1024+16)."""
    if m <= 0:
        return sublane
    min_steps = 1
    if num_tc > 1 and m * traffic_bytes_per_row >= num_tc * (512 << 10):
        min_steps = num_tc
    n_steps = max(min_steps, _cdiv(m, row_target))
    if num_tc > 1 and n_steps > 1:
        n_steps = _round_up(n_steps, num_tc)       # equal tile counts per TC
    if n_steps == 1:
        return m                                   # single full-extent block
    return _round_up(_cdiv(m, n_steps), sublane)


def feature_projection_mlp(x, w1, b1, w2, b2, *, tm=None, compute_dtype=None):
    """x: (B, N, C).  w1: (C, H), b1: (H,), w2: (H, C_out), b2: (C_out,).

    compute_dtype controls the MXU datapath (weights + in-kernel x cast); x
    itself is DMA'd in its own dtype, so pass bf16 x (and get bf16 out) to
    actually halve HBM traffic on this mem-bound kernel.
    """
    B, N, C = x.shape
    C_in, H = w1.shape
    H2, C_out = w2.shape
    assert C_in == C and H2 == H
    assert C_out == C, "module reshapes its output back to (B, N, C)"

    out_dtype = x.dtype
    if compute_dtype is None:
        compute_dtype = x.dtype
    compute_dtype = jnp.dtype(compute_dtype)
    x_is = jnp.dtype(x.dtype).itemsize
    out_is = jnp.dtype(out_dtype).itemsize
    ws = compute_dtype.itemsize
    sublane = 16 if x_is == 2 else 8

    M = B * N
    x2d = x.reshape(M, C)                         # view only: no pad / astype
    w1c = w1.astype(compute_dtype)
    w2c = w2.astype(compute_dtype)
    b1_2d = b1.reshape(1, H).astype(jnp.float32)
    b2_2d = b2.reshape(1, C_out).astype(jnp.float32)

    chip = _chip_params()
    if tm is None:
        tm = _choose_tm(M, sublane, chip["row_target"], chip["num_tc"],
                        C * x_is + C_out * out_is)
    else:
        tm = _round_up(max(int(tm), sublane), sublane)
    tm = min(tm, M)                               # full-dim block is always legal
    grid = (_cdiv(M, tm),)                        # last block masked by Pallas

    weight_bytes = (C * H + H * C_out) * ws
    bias_bytes = (H + C_out) * 4

    cost = pl.CostEstimate(
        flops=2 * M * C * H + 2 * M * H * C_out,
        transcendentals=0,
        bytes_accessed=(M * C * x_is + M * C_out * out_is
                        + weight_bytes + bias_bytes),
    )

    def build(single_buffered_weights):
        # Constant-index weight/bias blocks never benefit from a second
        # pipeline buffer; Buffered(1) frees that VMEM (matters under v7x's
        # 64 MiB budget).
        w_mode = ({"pipeline_mode": pl.Buffered(1)}
                  if single_buffered_weights else {})
        wbuf = 1 if single_buffered_weights else 2
        est = (2 * tm * C * x_is                  # x tile, double-buffered
               + 2 * tm * C_out * out_is          # out tile, double-buffered
               + wbuf * (weight_bytes + bias_bytes)
               + 2 * tm * H * 4 + tm * C_out * 4)  # f32 intermediates
        vmem_limit = int(min(max(int(1.5 * est), 8 << 20),
                             chip["vmem_soft_cap"]))
        return pl.pallas_call(
            _mlp_kernel,
            out_shape=jax.ShapeDtypeStruct((M, C_out), out_dtype),
            grid_spec=pltpu.PrefetchScalarGridSpec(
                num_scalar_prefetch=0,
                grid=grid,
                in_specs=[
                    pl.BlockSpec((tm, C), lambda i: (i, 0)),                 # x rows
                    pl.BlockSpec((C, H), lambda i: (0, 0), **w_mode),        # W1
                    pl.BlockSpec((1, H), lambda i: (0, 0), **w_mode),        # b1
                    pl.BlockSpec((H, C_out), lambda i: (0, 0), **w_mode),    # W2
                    pl.BlockSpec((1, C_out), lambda i: (0, 0), **w_mode),    # b2
                ],
                out_specs=pl.BlockSpec((tm, C_out), lambda i: (i, 0)),
            ),
            compiler_params=pltpu.CompilerParams(
                dimension_semantics=("parallel",),
                vmem_limit_bytes=vmem_limit,
            ),
            cost_estimate=cost,
        )

    try:
        out2d = build(True)(x2d, w1c, b1_2d, w2c, b2_2d)
    except Exception:
        # Fall back to default double-buffered pipelining if this Pallas
        # build rejects buffer_count=1.
        out2d = build(False)(x2d, w1c, b1_2d, w2c, b2_2d)

    return out2d.reshape(B, N, C_out)


if __name__ == "__main__":
    # Small shapes matching the module defaults: input_dim=output_dim=256,
    # hidden_dim=128; B=2, N=8.
    B, N = 2, 8
    input_dim, hidden_dim, output_dim = 256, 128, 256

    key = jax.random.PRNGKey(0)
    kx, kw1, kb1, kw2, kb2, kx2 = jax.random.split(key, 6)

    x = jax.random.normal(kx, (B, N, input_dim), dtype=jnp.float32)

    # Deterministic parameter init (uniform like torch's Linear default range).
    lim1 = 1.0 / (input_dim ** 0.5)
    lim2 = 1.0 / (hidden_dim ** 0.5)
    w1 = jax.random.uniform(kw1, (input_dim, hidden_dim), jnp.float32, -lim1, lim1)
    b1 = jax.random.uniform(kb1, (hidden_dim,), jnp.float32, -lim1, lim1)
    w2 = jax.random.uniform(kw2, (hidden_dim, output_dim), jnp.float32, -lim2, lim2)
    b2 = jax.random.uniform(kb2, (output_dim,), jnp.float32, -lim2, lim2)

    def ref_fn(xin):
        x2d = xin.reshape(-1, input_dim).astype(jnp.float32)
        r = jnp.maximum(x2d @ w1 + b1, 0.0) @ w2 + b2
        return r.reshape(xin.shape[0], xin.shape[1], output_dim)

    # 1) f32 path (exact module semantics).
    out = jax.block_until_ready(feature_projection_mlp(x, w1, b1, w2, b2))
    ref = ref_fn(x)
    assert out.shape == (B, N, output_dim)
    assert jnp.allclose(out, ref, atol=1e-5, rtol=1e-5)

    # 2) Non-tile-divisible row count (exercises Pallas boundary-block masking).
    x_odd = jax.random.normal(kx2, (3, 5, input_dim), dtype=jnp.float32)
    out_odd = jax.block_until_ready(feature_projection_mlp(x_odd, w1, b1, w2, b2))
    assert out_odd.shape == (3, 5, output_dim)
    assert jnp.allclose(out_odd, ref_fn(x_odd), atol=1e-5, rtol=1e-5)

    # 3) bf16 path: only pays when x is *already* bf16 in HBM, so cast the
    #    input first; output comes back bf16 (half the out traffic too).
    x_bf16 = x.astype(jnp.bfloat16)
    out_bf16 = jax.block_until_ready(feature_projection_mlp(x_bf16, w1, b1, w2, b2))
    assert out_bf16.dtype == jnp.bfloat16
    assert jnp.allclose(out_bf16.astype(jnp.float32), ref, atol=5e-2, rtol=5e-2)

    print("KERNEL_OK")
</pallas_src>

<mosaic_0001>
module attributes {stable_mosaic.version = 11 : i64} {
  func.func @_mlp_kernel(%arg0: i32, %arg1: memref<16x256xf32, #tpu.memory_space<vmem>>, %arg2: memref<256x128xf32, #tpu.memory_space<vmem>>, %arg3: memref<1x128xf32, #tpu.memory_space<vmem>>, %arg4: memref<128x256xf32, #tpu.memory_space<vmem>>, %arg5: memref<1x256xf32, #tpu.memory_space<vmem>>, %arg6: memref<16x256xf32, #tpu.memory_space<vmem>>) attributes {dimension_semantics = [#tpu.dimension_semantics<parallel>], iteration_bounds = array<i64: 1>, scalar_prefetch = 0 : i64, scratch_operands = 0 : i64, tpu.core_type = #tpu.core_type<tc>, window_params = [{transform_indices = @transform_0, window_bounds = array<i64: 16, 256>}, {pipeline_mode = #tpu.pipeline_mode<synchronous>, transform_indices = @transform_1, window_bounds = array<i64: 256, 128>}, {pipeline_mode = #tpu.pipeline_mode<synchronous>, transform_indices = @transform_2, window_bounds = array<i64: 1, 128>}, {pipeline_mode = #tpu.pipeline_mode<synchronous>, transform_indices = @transform_3, window_bounds = array<i64: 128, 256>}, {pipeline_mode = #tpu.pipeline_mode<synchronous>, transform_indices = @transform_4, window_bounds = array<i64: 1, 256>}, {transform_indices = @transform_5, window_bounds = array<i64: 16, 256>}]} {
    %c0 = arith.constant 0 : index
    %c0_0 = arith.constant 0 : index
    %0 = vector.load %arg1[%c0, %c0_0] : memref<16x256xf32, #tpu.memory_space<vmem>>, vector<16x256xf32>
    %c0_1 = arith.constant 0 : index
    %c0_2 = arith.constant 0 : index
    %1 = vector.load %arg2[%c0_1, %c0_2] : memref<256x128xf32, #tpu.memory_space<vmem>>, vector<256x128xf32>
    %cst = arith.constant dense<0.000000e+00> : vector<16x128xf32>
    %2 = tpu.matmul %0, %1, %cst {dimension_numbers = #tpu.dot_dimension_numbers<[1], [0], [0], [1], [0, 0, 1, 1], [], []>} : vector<16x256xf32>, vector<256x128xf32>, vector<16x128xf32> -> vector<16x128xf32>
    %c0_3 = arith.constant 0 : index
    %c0_4 = arith.constant 0 : index
    %3 = vector.load %arg3[%c0_3, %c0_4] : memref<1x128xf32, #tpu.memory_space<vmem>>, vector<1x128xf32>
    %4 = vector.broadcast %3 : vector<1x128xf32> to vector<16x128xf32>
    %5 = arith.addf %2, %4 : vector<16x128xf32>
    %cst_5 = arith.constant 0.000000e+00 : f32
    %6 = vector.broadcast %cst_5 : f32 to vector<16x128xf32>
    %7 = arith.maximumf %5, %6 : vector<16x128xf32>
    %c0_6 = arith.constant 0 : index
    %c0_7 = arith.constant 0 : index
    %8 = vector.load %arg4[%c0_6, %c0_7] : memref<128x256xf32, #tpu.memory_space<vmem>>, vector<128x256xf32>
    %cst_8 = arith.constant dense<0.000000e+00> : vector<16x256xf32>
    %9 = tpu.matmul %7, %8, %cst_8 {dimension_numbers = #tpu.dot_dimension_numbers<[1], [0], [0], [1], [0, 0, 1, 1], [], []>} : vector<16x128xf32>, vector<128x256xf32>, vector<16x256xf32> -> vector<16x256xf32>
    %c0_9 = arith.constant 0 : index
    %c0_10 = arith.constant 0 : index
    %10 = vector.load %arg5[%c0_9, %c0_10] : memref<1x256xf32, #tpu.memory_space<vmem>>, vector<1x256xf32>
    %11 = vector.broadcast %10 : vector<1x256xf32> to vector<16x256xf32>
    %12 = arith.addf %9, %11 : vector<16x256xf32>
    %c0_11 = arith.constant 0 : index
    %c0_12 = arith.constant 0 : index
    %13 = vector.load %arg6[%c0_11, %c0_12] : memref<16x256xf32, #tpu.memory_space<vmem>>, vector<16x256xf32>
    tpu.vector_store %arg6[%c0_11, %c0_12], %12 {strides = array<i32>} : memref<16x256xf32, #tpu.memory_space<vmem>>, vector<16x256xf32>,
    return
  }
  func.func @transform_0(%arg0: i32) -> (i32, i32) {
    %c0_i32 = arith.constant 0 : i32
    %c0_i32_0 = arith.constant 0 : i32
    return %arg0, %c0_i32 : i32, i32
  }
  func.func @transform_1(%arg0: i32) -> (i32, i32) {
    %c0_i32 = arith.constant 0 : i32
    %c0_i32_0 = arith.constant 0 : i32
    %c0_i32_1 = arith.constant 0 : i32
    return %c0_i32, %c0_i32_0 : i32, i32
  }
  func.func @transform_2(%arg0: i32) -> (i32, i32) {
    %c0_i32 = arith.constant 0 : i32
    %c0_i32_0 = arith.constant 0 : i32
    %c0_i32_1 = arith.constant 0 : i32
    return %c0_i32, %c0_i32_0 : i32, i32
  }
  func.func @transform_3(%arg0: i32) -> (i32, i32) {
    %c0_i32 = arith.constant 0 : i32
    %c0_i32_0 = arith.constant 0 : i32
    %c0_i32_1 = arith.constant 0 : i32
    return %c0_i32, %c0_i32_0 : i32, i32
  }
  func.func @transform_4(%arg0: i32) -> (i32, i32) {
    %c0_i32 = arith.constant 0 : i32
    %c0_i32_0 = arith.constant 0 : i32
    %c0_i32_1 = arith.constant 0 : i32
    return %c0_i32, %c0_i32_0 : i32, i32
  }
  func.func @transform_5(%arg0: i32) -> (i32, i32) {
    %c0_i32 = arith.constant 0 : i32
    %c0_i32_0 = arith.constant 0 : i32
    return %arg0, %c0_i32 : i32, i32
  }
}

module attributes {stable_mosaic.version = 11 : i64} {
  func.func @_mlp_kernel(%arg0: i32, %arg1: memref<16x256xf32, #tpu.memory_space<vmem>>, %arg2: memref<256x128xf32, #tpu.memory_space<vmem>>, %arg3: memref<1x128xf32, #tpu.memory_space<vmem>>, %arg4: memref<128x256xf32, #tpu.memory_space<vmem>>, %arg5: memref<1x256xf32, #tpu.memory_space<vmem>>, %arg6: memref<16x256xf32, #tpu.memory_space<vmem>>) attributes {dimension_semantics = [#tpu.dimension_semantics<parallel>], iteration_bounds = array<i64: 1>, scalar_prefetch = 0 : i64, scratch_operands = 0 : i64, tpu.core_type = #tpu.core_type<tc>, window_params = [{transform_indices = @transform_0, window_bounds = array<i64: 16, 256>}, {pipeline_mode = #tpu.pipeline_mode<synchronous>, transform_indices = @transform_1, window_bounds = array<i64: 256, 128>}, {pipeline_mode = #tpu.pipeline_mode<synchronous>, transform_indices = @transform_2, window_bounds = array<i64: 1, 128>}, {pipeline_mode = #tpu.pipeline_mode<synchronous>, transform_indices = @transform_3, window_bounds = array<i64: 128, 256>}, {pipeline_mode = #tpu.pipeline_mode<synchronous>, transform_indices = @transform_4, window_bounds = array<i64: 1, 256>}, {transform_indices = @transform_5, window_bounds = array<i64: 16, 256>}]} {
    %c0 = arith.constant 0 : index
    %c0_0 = arith.constant 0 : index
    %0 = vector.load %arg1[%c0, %c0_0] : memref<16x256xf32, #tpu.memory_space<vmem>>, vector<16x256xf32>
    %c0_1 = arith.constant 0 : index
    %c0_2 = arith.constant 0 : index
    %1 = vector.load %arg2[%c0_1, %c0_2] : memref<256x128xf32, #tpu.memory_space<vmem>>, vector<256x128xf32>
    %cst = arith.constant dense<0.000000e+00> : vector<16x128xf32>
    %2 = tpu.matmul %0, %1, %cst {dimension_numbers = #tpu.dot_dimension_numbers<[1], [0], [0], [1], [0, 0, 1, 1], [], []>} : vector<16x256xf32>, vector<256x128xf32>, vector<16x128xf32> -> vector<16x128xf32>
    %c0_3 = arith.constant 0 : index
    %c0_4 = arith.constant 0 : index
    %3 = vector.load %arg3[%c0_3, %c0_4] : memref<1x128xf32, #tpu.memory_space<vmem>>, vector<1x128xf32>
    %4 = vector.broadcast %3 : vector<1x128xf32> to vector<16x128xf32>
    %5 = arith.addf %2, %4 : vector<16x128xf32>
    %cst_5 = arith.constant 0.000000e+00 : f32
    %6 = vector.broadcast %cst_5 : f32 to vector<16x128xf32>
    %7 = arith.maximumf %5, %6 : vector<16x128xf32>
    %c0_6 = arith.constant 0 : index
    %c0_7 = arith.constant 0 : index
    %8 = vector.load %arg4[%c0_6, %c0_7] : memref<128x256xf32, #tpu.memory_space<vmem>>, vector<128x256xf32>
    %cst_8 = arith.constant dense<0.000000e+00> : vector<16x256xf32>
    %9 = tpu.matmul %7, %8, %cst_8 {dimension_numbers = #tpu.dot_dimension_numbers<[1], [0], [0], [1], [0, 0, 1, 1], [], []>} : vector<16x128xf32>, vector<128x256xf32>, vector<16x256xf32> -> vector<16x256xf32>
    %c0_9 = arith.constant 0 : index
    %c0_10 = arith.constant 0 : index
    %10 = vector.load %arg5[%c0_9, %c0_10] : memref<1x256xf32, #tpu.memory_space<vmem>>, vector<1x256xf32>
    %11 = vector.broadcast %10 : vector<1x256xf32> to vector<16x256xf32>
    %12 = arith.addf %9, %11 : vector<16x256xf32>
    %c0_11 = arith.constant 0 : index
    %c0_12 = arith.constant 0 : index
    %13 = vector.load %arg6[%c0_11, %c0_12] : memref<16x256xf32, #tpu.memory_space<vmem>>, vector<16x256xf32>
    tpu.vector_store %arg6[%c0_11, %c0_12], %12 {strides = array<i32>} : memref<16x256xf32, #tpu.memory_space<vmem>>, vector<16x256xf32>,
    return
  }
  func.func @transform_0(%arg0: i32) -> (i32, i32) {
    %c0_i32 = arith.constant 0 : i32
    %c0_i32_0 = arith.constant 0 : i32
    return %arg0, %c0_i32 : i32, i32
  }
  func.func @transform_1(%arg0: i32) -> (i32, i32) {
    %c0_i32 = arith.constant 0 : i32
    %c0_i32_0 = arith.constant 0 : i32
    %c0_i32_1 = arith.constant 0 : i32
    return %c0_i32, %c0_i32_0 : i32, i32
  }
  func.func @transform_2(%arg0: i32) -> (i32, i32) {
    %c0_i32 = arith.constant 0 : i32
    %c0_i32_0 = arith.constant 0 : i32
    %c0_i32_1 = arith.constant 0 : i32
    return %c0_i32, %c0_i32_0 : i32, i32
  }
  func.func @transform_3(%arg0: i32) -> (i32, i32) {
    %c0_i32 = arith.constant 0 : i32
    %c0_i32_0 = arith.constant 0 : i32
    %c0_i32_1 = arith.constant 0 : i32
    return %c0_i32, %c0_i32_0 : i32, i32
  }
  func.func @transform_4(%arg0: i32) -> (i32, i32) {
    %c0_i32 = arith.constant 0 : i32
    %c0_i32_0 = arith.constant 0 : i32
    %c0_i32_1 = arith.constant 0 : i32
    return %c0_i32, %c0_i32_0 : i32, i32
  }
  func.func @transform_5(%arg0: i32) -> (i32, i32) {
    %c0_i32 = arith.constant 0 : i32
    %c0_i32_0 = arith.constant 0 : i32
    return %arg0, %c0_i32 : i32, i32
  }
}

</mosaic_0001>

<bundles_post_ra>
// kernel: tpu_custom_call.1
= control target key start
LH: loop header
LB: loop body
LE: loop exit
PB: predicated region body
PF: predicated region fallthrough
CT: control target
= control target key end

     0   :  { %10 = vsyncpa [#allocation3], 0  ;;  %s440_s0 = inlined_call_operand.hbm [shape: f32[16,256], index: 0, kind: input, shape index: {}]   ;;  %s441_s1 = inlined_call_operand.hbm [shape: f32[256,128], index: 1, kind: input, shape index: {}]   ;;  %s442_s2 = inlined_call_operand.vmem [shape: f32[1,128], index: 2, kind: input, shape index: {}]   ;;  %s443_s3 = inlined_call_operand.hbm [shape: f32[128,256], index: 3, kind: input, shape index: {}]   ;;  %s444_s4 = inlined_call_operand.vmem [shape: f32[1,256], index: 4, kind: input, shape index: {}]   ;;  %s445_s5 = inlined_call_operand.hbm [shape: f32[16,256], index: 5, kind: output, shape index: {}]  }
   0x1   :  { %11 = vsyncpa [#allocation6], 0  ;;  %s30_s20 = sshll.u32 %s441_s1, 4  ;;  %s31_s20 = int_to_ptr.hbm [resolvable:$true] %s30_s20 }
   0x2   :  { %12 = vsyncpa [#allocation4], 0  ;;  %s375_s21 = smov [#allocation5]   ;;  %s17_s25 = sshll.u32 %s440_s0, 4  ;;  %s18_s25 = int_to_ptr.hbm [resolvable:$true] %s17_s25 }
   0x3   :  { %s32_s22 = sshll.u32 %s375_s21, 4  ;;  %s376_s26 = smov 128   ;;  %s33_s22 = int_to_ptr.vmem [resolvable:$true] %s32_s22 }
   0x4   :  { %s377_s27 = smov 8   ;;  %s378_s28 = smov [#allocation2]  }
   0x5   :  { %38 = dma.hbm_to_vmem [thread:$0]  %s31_s20, 4096, %s33_s22, [#allocation6], %s376_s26, %s376_s26, %s377_s27  }
   0x6   :  { %s19_s29 = sshll.u32 %s378_s28, 4  ;;  %s379_s30 = smov 256   ;;  %s20_s29 = int_to_ptr.vmem [resolvable:$true] %s19_s29 }
   0x7   :  { %s380_s6 = smov 16   ;;  %s45_s8 = sshll.u32 %s443_s3, 4  ;;  %s46_s8 = int_to_ptr.hbm [resolvable:$true] %s45_s8 }
   0x8   :  { %25 = dma.hbm_to_vmem [thread:$0]  %s18_s25, 512, %s20_s29, [#allocation3], %s379_s30, %s379_s30, %s380_s6  }
   0x9   :  { %s381_s9 = smov [#allocation7]  }
   0xa   :  { %s47_s0 = sshll.u32 %s381_s9, 4  ;;  %s48_s0 = int_to_ptr.vmem [resolvable:$true] %s47_s0 }
   0xb   :  { %53 = dma.hbm_to_vmem [thread:$0]  %s46_s8, 4096, %s48_s0, [#allocation6], %s379_s30, %s379_s30, %s380_s6  }
   0xc   :  { %369 = dma.done.wait [#allocation3], 512  }
   0xd   :  { %370 = vsyncadd [#allocation3], 4294966784 }
   0xe   :  { %371 = dma.done.wait [#allocation6], 8192  }
   0xf   :  { %372 = vsyncadd [#allocation6], 4294959104  ;;  %v87_v0 = vld [vmem:[#allocation5 + $0x78] sm:$0xff]  ;;  %v86_v1 = vld [vmem:[#allocation5 + $0x70] sm:$0xff]  ;;  %s250_s16 = sshll.u32 %s445_s5, 4  ;;  %s251_s16 = int_to_ptr.hbm [resolvable:$true] %s250_s16 }
  0x10   :  { %v103_v2 = vld [vmem:[#allocation5 + $0xf8] sm:$0xff]  ;;  %108 = vmatpush.msra.mxu0 %v87_v0  ;;  %v102_v3 = vld [vmem:[#allocation5 + $0xf0] sm:$0xff]  ;;  %v85_v4 = vld [vmem:[#allocation5 + $0x68] sm:$0xff] }
  0x11   :  { %131 = vmatpush.msra.mxu1 %v103_v2  ;;  %v101_v5 = vld [vmem:[#allocation5 + $0xe8] sm:$0xff]  ;;  %v84_v6 = vld [vmem:[#allocation5 + $0x60] sm:$0xff]  ;;  %v83_v8 = vld [vmem:[#allocation5 + $0x58] sm:$0xff] }
  0x12   :  { %109 = vmatpush.msra.mxu0 %v86_v1  ;;  %v100_v7 = vld [vmem:[#allocation5 + $0xe0] sm:$0xff]  ;;  %v99_v9 = vld [vmem:[#allocation5 + $0xd8] sm:$0xff]  ;;  %v82_v10 = vld [vmem:[#allocation5 + $0x50] sm:$0xff] }
  0x13   :  { %132 = vmatpush.msra.mxu1 %v102_v3  ;;  %v98_v11 = vld [vmem:[#allocation5 + $0xd0] sm:$0xff]  ;;  %v81_v12 = vld [vmem:[#allocation5 + $0x48] sm:$0xff]  ;;  %v80_v14 = vld [vmem:[#allocation5 + $0x40] sm:$0xff] }
  0x14   :  { %110 = vmatpush.msra.mxu0 %v85_v4  ;;  %v97_v13 = vld [vmem:[#allocation5 + $0xc8] sm:$0xff]  ;;  %v96_v15 = vld [vmem:[#allocation5 + $0xc0] sm:$0xff]  ;;  %v186_v16 = vld [vmem:[#allocation7 + $0xf0] sm:$0xff] }
  0x15   :  { %133 = vmatpush.msra.mxu1 %v101_v5  ;;  %v187_v17 = vld [vmem:[#allocation7 + $0xf8] sm:$0xff]  ;;  %v184_v18 = vld [vmem:[#allocation7 + $0xe0] sm:$0xff]  ;;  %v185_v19 = vld [vmem:[#allocation7 + $0xe8] sm:$0xff]  ;;  %194 = vmatpush.msra.mxu2 %v186_v16 }
  0x16   :  { %111 = vmatpush.msra.mxu0 %v84_v6  ;;  %v79_v20 = vld [vmem:[#allocation5 + $0x38] sm:$0xff]  ;;  %217 = vmatpush.msra.mxu3 %v187_v17  ;;  %v182_v22 = vld [vmem:[#allocation7 + $0xd0] sm:$0xff]  ;;  %v180_v26 = vld [vmem:[#allocation7 + $0xc0] sm:$0xff] }
  0x17   :  { %134 = vmatpush.msra.mxu1 %v100_v7  ;;  %v95_v21 = vld [vmem:[#allocation5 + $0xb8] sm:$0xff]  ;;  %v78_v24 = vld [vmem:[#allocation5 + $0x30] sm:$0xff]  ;;  %195 = vmatpush.msra.mxu2 %v184_v18  ;;  %v181_v27 = vld [vmem:[#allocation7 + $0xc8] sm:$0xff] }
  0x18   :  { %112 = vmatpush.msra.mxu0 %v83_v8  ;;  %v183_v23 = vld [vmem:[#allocation7 + $0xd8] sm:$0xff]  ;;  %v94_v25 = vld [vmem:[#allocation5 + $0xb0] sm:$0xff]  ;;  %218 = vmatpush.msra.mxu3 %v185_v19  ;;  %v77_v28 = vld [vmem:[#allocation5 + $0x28] sm:$0xff] }
  0x19   :  { %135 = vmatpush.msra.mxu1 %v99_v9  ;;  %v93_v29 = vld [vmem:[#allocation5 + $0xa8] sm:$0xff]  ;;  %196 = vmatpush.msra.mxu2 %v182_v22  ;;  %v178_v30 = vld [vmem:[#allocation7 + $0xb0] sm:$0xff]  ;;  %v179_v31 = vld [vmem:[#allocation7 + $0xb8] sm:$0xff] }
  0x1a   :  { %113 = vmatpush.msra.mxu0 %v82_v10  ;;  %219 = vmatpush.msra.mxu3 %v183_v23  ;;  %v76_v32 = vld [vmem:[#allocation5 + $0x20] sm:$0xff]  ;;  %v177_v35 = vld [vmem:[#allocation7 + $0xa8] sm:$0xff]  ;;  %v75_v36 = vld [vmem:[#allocation5 + $0x18] sm:$0xff] }
  0x1b   :  { %136 = vmatpush.msra.mxu1 %v98_v11  ;;  %v92_v33 = vld [vmem:[#allocation5 + $0xa0] sm:$0xff]  ;;  %197 = vmatpush.msra.mxu2 %v180_v26  ;;  %v91_v37 = vld [vmem:[#allocation5 + $0x98] sm:$0xff]  ;;  %v174_v38 = vld [vmem:[#allocation7 + $0x90] sm:$0xff] }
  0x1c   :  { %114 = vmatpush.msra.mxu0 %v81_v12  ;;  %220 = vmatpush.msra.mxu3 %v181_v27  ;;  %v176_v34 = vld [vmem:[#allocation7 + $0xa0] sm:$0xff]  ;;  %v175_v39 = vld [vmem:[#allocation7 + $0x98] sm:$0xff]  ;;  %v74_v40 = vld [vmem:[#allocation5 + $0x10] sm:$0xff] }
  0x1d   :  { %137 = vmatpush.msra.mxu1 %v97_v13  ;;  %198 = vmatpush.msra.mxu2 %v178_v30  ;;  %v90_v41 = vld [vmem:[#allocation5 + $0x90] sm:$0xff]  ;;  %v172_v42 = vld [vmem:[#allocation7 + $0x80] sm:$0xff]  ;;  %v173_v43 = vld [vmem:[#allocation7 + $0x88] sm:$0xff] }
  0x1e   :  { %115 = vmatpush.msra.mxu0 %v80_v14  ;;  %221 = vmatpush.msra.mxu3 %v179_v31  ;;  %v73_v44 = vld [vmem:[#allocation5 + $0x8] sm:$0xff]  ;;  %v170_v46 = vld [vmem:[#allocation7 + $0x70] sm:$0xff]  ;;  %v171_v47 = vld [vmem:[#allocation7 + $0x78] sm:$0xff] }
  0x1f   :  { %138 = vmatpush.msra.mxu1 %v96_v15  ;;  %199 = vmatpush.msra.mxu2 %v176_v34  ;;  %v89_v45 = vld [vmem:[#allocation5 + $0x88] sm:$0xff]  ;;  %v72_v48 = vld [vmem:[#allocation5] sm:$0xff]  ;;  %v166_v54 = vld [vmem:[#allocation7 + $0x50] sm:$0xff] }
  0x20   :  { %116 = vmatpush.msra.mxu0 %v79_v20  ;;  %222 = vmatpush.msra.mxu3 %v177_v35  ;;  %v88_v49 = vld [vmem:[#allocation5 + $0x80] sm:$0xff]  ;;  %v69_v51 = vld [vmem:[#allocation2 + $0x8] sm:$0xff]  ;;  %v167_v55 = vld [vmem:[#allocation7 + $0x58] sm:$0xff] }
  0x21   :  { %139 = vmatpush.msra.mxu1 %v95_v21  ;;  %200 = vmatpush.msra.mxu2 %v174_v38  ;;  %v68_v50 = vld [vmem:[#allocation2] sm:$0xff]  ;;  %v169_v53 = vld [vmem:[#allocation7 + $0x68] sm:$0xff]  ;;  %v70_v58 = vld [vmem:[#allocation2 + $0x10] sm:$0xff] }
  0x22   :  { %117 = vmatpush.msra.mxu0 %v78_v24  ;;  %223 = vmatpush.msra.mxu3 %v175_v39  ;;  %v168_v52 = vld [vmem:[#allocation7 + $0x60] sm:$0xff]  ;;  %v165_v57 = vld [vmem:[#allocation7 + $0x48] sm:$0xff]  ;;  %v71_v59 = vld [vmem:[#allocation2 + $0x18] sm:$0xff] }
  0x23   :  { %140 = vmatpush.msra.mxu1 %v94_v25  ;;  %201 = vmatpush.msra.mxu2 %v172_v42  ;;  %v164_v56 = vld [vmem:[#allocation7 + $0x40] sm:$0xff]  ;;  %v162_v60 = vld [vmem:[#allocation7 + $0x30] sm:$0xff]  ;;  %v163_v61 = vld [vmem:[#allocation7 + $0x38] sm:$0xff] }
  0x24   :  { %118 = vmatpush.msra.mxu0 %v77_v28  ;;  %224 = vmatpush.msra.mxu3 %v173_v43  ;;  %v160_v62 = vld [vmem:[#allocation7 + $0x20] sm:$0xff]  ;;  %v161_v63 = vld [vmem:[#allocation7 + $0x28] sm:$0xff]  ;;  %v158_v0 = vld [vmem:[#allocation7 + $0x10] sm:$0xff] }
  0x25   :  { %141 = vmatpush.msra.mxu1 %v93_v29  ;;  %202 = vmatpush.msra.mxu2 %v170_v46  ;;  %v159_v1 = vld [vmem:[#allocation7 + $0x18] sm:$0xff]  ;;  %v156_v2 = vld [vmem:[#allocation7] sm:$0xff]  ;;  %v157_v3 = vld [vmem:[#allocation7 + $0x8] sm:$0xff] }
  0x26   :  { %119 = vmatpush.msra.mxu0 %v76_v32  ;;  %225 = vmatpush.msra.mxu3 %v171_v47  ;;  %v272_v4 = vld [vmem:[%s442_s2] ss:$0 sm:$0xff]  ;;  %s382_s2 = smov [#allocation8]  }
  0x27   :  { %142 = vmatpush.msra.mxu1 %v92_v33  ;;  %203 = vmatpush.msra.mxu2 %v168_v52  ;;  %v188_v15 = vld [vmem:[%s444_s4] sm:$0x3]  ;;  %s248_s13 = sshll.u32 %s382_s2, 4  ;;  %s249_s13 = int_to_ptr.vmem [resolvable:$true] %s248_s13 }
  0x28   :  { %120 = vmatpush.msra.mxu0 %v75_v36  ;;  %226 = vmatpush.msra.mxu3 %v169_v53  ;;  %v190_v16 = vperm.slane %v188_v15, 0  ;;  %v191_v17 = vperm.slane %v188_v15, 1 }
  0x29   :  { %143 = vmatpush.msra.mxu1 %v91_v37  ;;  %204 = vmatpush.msra.mxu2 %v166_v54 }
  0x2a   :  { %121 = vmatpush.msra.mxu0 %v74_v40  ;;  %227 = vmatpush.msra.mxu3 %v167_v55 }
  0x2b   :  { %144 = vmatpush.msra.mxu1 %v90_v41  ;;  %205 = vmatpush.msra.mxu2 %v164_v56 }
  0x2c   :  { %122 = vmatpush.msra.mxu0 %v73_v44  ;;  %228 = vmatpush.msra.mxu3 %v165_v57 }
  0x2d   :  { %145 = vmatpush.msra.mxu1 %v89_v45  ;;  %206 = vmatpush.msra.mxu2 %v162_v60 }
  0x2e   :  { %123 = vmatpush.msra.mxu0 %v72_v48  ;;  %229 = vmatpush.msra.mxu3 %v163_v61 }
  0x2f   :  { %146 = vmatpush.msra.mxu1 %v88_v49  ;;  %124 = vmatmul.f32.vlgmr.msra.gmra.mxu0 %v68_v50 }
  0x30   :  { %147 = vmatmul.f32.vlgmr.msra.gmra.mxu1 %v69_v51  ;;  %207 = vmatpush.msra.mxu2 %v160_v62 }
  0x31   :  { %230 = vmatpush.msra.mxu3 %v161_v63 }
  0x32   :  { %208 = vmatpush.msra.mxu2 %v158_v0 }
  0x33   :  { %231 = vmatpush.msra.mxu3 %v159_v1 }
  0x34   :  { %209 = vmatpush.msra.mxu2 %v156_v2 }
  0x35   :  { %232 = vmatpush.msra.mxu3 %v157_v3 }
  0x37   :  { %127 = vmatmul.f32.gmra.mxu0 %v70_v58 }
  0x38   :  { %150 = vmatmul.f32.gmra.mxu1 %v71_v59 }
  0xac   :  { %v125_v5 = vpop.f32.mrf.mxu0 }
  0xad   :  { %v148_v6 = vpop.f32.mrf.mxu1  ;;  %v126_v7 = vadd.f32 %v272_v4, %v125_v5 }
  0xaf   :  { %v149_v8 = vadd.f32 %v148_v6, %v126_v7 }
  0xb1   :  { %v154_v9 = vmax.f32 %v149_v8, 0.0 }
  0xb3   :  { %210 = vmatmul.f32.vlgmr.msra.gmra.mxu2 %v154_v9  ;;  %233 = vmatmul.f32.vlgmr.msra.gmra.mxu3 %v154_v9 }
  0xb4   :  { %v128_v10 = vpop.f32.mrf.mxu0 }
  0xb5   :  { %v151_v11 = vpop.f32.mrf.mxu1  ;;  %v129_v12 = vadd.f32 %v272_v4, %v128_v10 }
  0xb7   :  { %v152_v13 = vadd.f32 %v151_v11, %v129_v12 }
  0xb9   :  { %v155_v14 = vmax.f32 %v152_v13, 0.0 }
  0xbb   :  { %213 = vmatmul.f32.gmra.mxu2 %v155_v14  ;;  %236 = vmatmul.f32.gmra.mxu3 %v155_v14 }
 0x136   :  { %v211_v18 = vpop.f32.mrf.mxu2  ;;  %v234_v19 = vpop.f32.mrf.mxu3 }
 0x137   :  { %v212_v20 = vadd.f32 %v211_v18, %v190_v16  ;;  %v235_v21 = vadd.f32 %v234_v19, %v191_v17 }
 0x139   :  { %240 = vst [vmem:[#allocation8] sm:$0xff] %v212_v20 }
 0x13a   :  { %241 = vst [vmem:[#allocation8 + $0x8] sm:$0xff] %v235_v21 }
 0x13e   :  { %v214_v22 = vpop.f32.mrf.mxu2  ;;  %v237_v23 = vpop.f32.mrf.mxu3 }
 0x13f   :  { %v215_v24 = vadd.f32 %v214_v22, %v190_v16  ;;  %v238_v25 = vadd.f32 %v237_v23, %v191_v17 }
 0x141   :  { %242 = vst [vmem:[#allocation8 + $0x10] sm:$0xff] %v215_v24 }
 0x142   :  { %243 = vst [vmem:[#allocation8 + $0x18] sm:$0xff] %v238_v25 }
 0x143   :  { %256 = dma.vmem_to_hbm [thread:$0]  %s249_s13, 512, %s251_s16, [#allocation4], %s379_s30, %s379_s30, %s380_s6  }
 0x144   :  { %373 = dma.done.wait [#allocation4], 512  }
 0x145   :  { %374 = vsyncadd [#allocation4], 4294966784 }
 0x146   :  { %261 = vsyncpa [#allocation3], 1 }
 0x147   :  { %262 = vsyncpa [#allocation6], 1 }
 0x148   :  { %263 = vsyncpa [#allocation4], 1 }

// kernel: tpu_custom_call.1
= control target key start
LH: loop header
LB: loop body
LE: loop exit
PB: predicated region body
PF: predicated region fallthrough
CT: control target
= control target key end

     0   :  { %10 = vsyncpa [#allocation3], 0  ;;  %s440_s0 = inlined_call_operand.hbm [shape: f32[16,256], index: 0, kind: input, shape index: {}]   ;;  %s441_s1 = inlined_call_operand.hbm [shape: f32[256,128], index: 1, kind: input, shape index: {}]   ;;  %s442_s2 = inlined_call_operand.vmem [shape: f32[1,128], index: 2, kind: input, shape index: {}]   ;;  %s443_s3 = inlined_call_operand.hbm [shape: f32[128,256], index: 3, kind: input, shape index: {}]   ;;  %s444_s4 = inlined_call_operand.vmem [shape: f32[1,256], index: 4, kind: input, shape index: {}]   ;;  %s445_s5 = inlined_call_operand.hbm [shape: f32[16,256], index: 5, kind: output, shape index: {}]  }
   0x1   :  { %11 = vsyncpa [#allocation6], 0  ;;  %s30_s20 = sshll.u32 %s441_s1, 4  ;;  %s31_s20 = int_to_ptr.hbm [resolvable:$true] %s30_s20 }
   0x2   :  { %12 = vsyncpa [#allocation4], 0  ;;  %s375_s21 = smov [#allocation5]   ;;  %s17_s25 = sshll.u32 %s440_s0, 4  ;;  %s18_s25 = int_to_ptr.hbm [resolvable:$true] %s17_s25 }
   0x3   :  { %s32_s22 = sshll.u32 %s375_s21, 4  ;;  %s376_s26 = smov 128   ;;  %s33_s22 = int_to_ptr.vmem [resolvable:$true] %s32_s22 }
   0x4   :  { %s377_s27 = smov 8   ;;  %s378_s28 = smov [#allocation2]  }
   0x5   :  { %38 = dma.hbm_to_vmem [thread:$0]  %s31_s20, 4096, %s33_s22, [#allocation6], %s376_s26, %s376_s26, %s377_s27  }
   0x6   :  { %s19_s29 = sshll.u32 %s378_s28, 4  ;;  %s379_s30 = smov 256   ;;  %s20_s29 = int_to_ptr.vmem [resolvable:$true] %s19_s29 }
   0x7   :  { %s380_s6 = smov 16   ;;  %s45_s8 = sshll.u32 %s443_s3, 4  ;;  %s46_s8 = int_to_ptr.hbm [resolvable:$true] %s45_s8 }
   0x8   :  { %25 = dma.hbm_to_vmem [thread:$0]  %s18_s25, 512, %s20_s29, [#allocation3], %s379_s30, %s379_s30, %s380_s6  }
   0x9   :  { %s381_s9 = smov [#allocation7]  }
   0xa   :  { %s47_s0 = sshll.u32 %s381_s9, 4  ;;  %s48_s0 = int_to_ptr.vmem [resolvable:$true] %s47_s0 }
   0xb   :  { %53 = dma.hbm_to_vmem [thread:$0]  %s46_s8, 4096, %s48_s0, [#allocation6], %s379_s30, %s379_s30, %s380_s6  }
   0xc   :  { %369 = dma.done.wait [#allocation3], 512  }
   0xd   :  { %370 = vsyncadd [#allocation3], 4294966784 }
   0xe   :  { %371 = dma.done.wait [#allocation6], 8192  }
   0xf   :  { %372 = vsyncadd [#allocation6], 4294959104  ;;  %v87_v0 = vld [vmem:[#allocation5 + $0x78] sm:$0xff]  ;;  %v86_v1 = vld [vmem:[#allocation5 + $0x70] sm:$0xff]  ;;  %s250_s16 = sshll.u32 %s445_s5, 4  ;;  %s251_s16 = int_to_ptr.hbm [resolvable:$true] %s250_s16 }
  0x10   :  { %v103_v2 = vld [vmem:[#allocation5 + $0xf8] sm:$0xff]  ;;  %108 = vmatpush.msra.mxu0 %v87_v0  ;;  %v102_v3 = vld [vmem:[#allocation5 + $0xf0] sm:$0xff]  ;;  %v85_v4 = vld [vmem:[#allocation5 + $0x68] sm:$0xff] }
  0x11   :  { %131 = vmatpush.msra.mxu1 %v103_v2  ;;  %v101_v5 = vld [vmem:[#allocation5 + $0xe8] sm:$0xff]  ;;  %v84_v6 = vld [vmem:[#allocation5 + $0x60] sm:$0xff]  ;;  %v83_v8 = vld [vmem:[#allocation5 + $0x58] sm:$0xff] }
  0x12   :  { %109 = vmatpush.msra.mxu0 %v86_v1  ;;  %v100_v7 = vld [vmem:[#allocation5 + $0xe0] sm:$0xff]  ;;  %v99_v9 = vld [vmem:[#allocation5 + $0xd8] sm:$0xff]  ;;  %v82_v10 = vld [vmem:[#allocation5 + $0x50] sm:$0xff] }
  0x13   :  { %132 = vmatpush.msra.mxu1 %v102_v3  ;;  %v98_v11 = vld [vmem:[#allocation5 + $0xd0] sm:$0xff]  ;;  %v81_v12 = vld [vmem:[#allocation5 + $0x48] sm:$0xff]  ;;  %v80_v14 = vld [vmem:[#allocation5 + $0x40] sm:$0xff] }
  0x14   :  { %110 = vmatpush.msra.mxu0 %v85_v4  ;;  %v97_v13 = vld [vmem:[#allocation5 + $0xc8] sm:$0xff]  ;;  %v96_v15 = vld [vmem:[#allocation5 + $0xc0] sm:$0xff]  ;;  %v186_v16 = vld [vmem:[#allocation7 + $0xf0] sm:$0xff] }
  0x15   :  { %133 = vmatpush.msra.mxu1 %v101_v5  ;;  %v187_v17 = vld [vmem:[#allocation7 + $0xf8] sm:$0xff]  ;;  %v184_v18 = vld [vmem:[#allocation7 + $0xe0] sm:$0xff]  ;;  %v185_v19 = vld [vmem:[#allocation7 + $0xe8] sm:$0xff]  ;;  %194 = vmatpush.msra.mxu2 %v186_v16 }
  0x16   :  { %111 = vmatpush.msra.mxu0 %v84_v6  ;;  %v79_v20 = vld [vmem:[#allocation5 + $0x38] sm:$0xff]  ;;  %217 = vmatpush.msra.mxu3 %v187_v17  ;;  %v182_v22 = vld [vmem:[#allocation7 + $0xd0] sm:$0xff]  ;;  %v180_v26 = vld [vmem:[#allocation7 + $0xc0] sm:$0xff] }
  0x17   :  { %134 = vmatpush.msra.mxu1 %v100_v7  ;;  %v95_v21 = vld [vmem:[#allocation5 + $0xb8] sm:$0xff]  ;;  %v78_v24 = vld [vmem:[#allocation5 + $0x30] sm:$0xff]  ;;  %195 = vmatpush.msra.mxu2 %v184_v18  ;;  %v181_v27 = vld [vmem:[#allocation7 + $0xc8] sm:$0xff] }
  0x18   :  { %112 = vmatpush.msra.mxu0 %v83_v8  ;;  %v183_v23 = vld [vmem:[#allocation7 + $0xd8] sm:$0xff]  ;;  %v94_v25 = vld [vmem:[#allocation5 + $0xb0] sm:$0xff]  ;;  %218 = vmatpush.msra.mxu3 %v185_v19  ;;  %v77_v28 = vld [vmem:[#allocation5 + $0x28] sm:$0xff] }
  0x19   :  { %135 = vmatpush.msra.mxu1 %v99_v9  ;;  %v93_v29 = vld [vmem:[#allocation5 + $0xa8] sm:$0xff]  ;;  %196 = vmatpush.msra.mxu2 %v182_v22  ;;  %v178_v30 = vld [vmem:[#allocation7 + $0xb0] sm:$0xff]  ;;  %v179_v31 = vld [vmem:[#allocation7 + $0xb8] sm:$0xff] }
  0x1a   :  { %113 = vmatpush.msra.mxu0 %v82_v10  ;;  %219 = vmatpush.msra.mxu3 %v183_v23  ;;  %v76_v32 = vld [vmem:[#allocation5 + $0x20] sm:$0xff]  ;;  %v177_v35 = vld [vmem:[#allocation7 + $0xa8] sm:$0xff]  ;;  %v75_v36 = vld [vmem:[#allocation5 + $0x18] sm:$0xff] }
  0x1b   :  { %136 = vmatpush.msra.mxu1 %v98_v11  ;;  %v92_v33 = vld [vmem:[#allocation5 + $0xa0] sm:$0xff]  ;;  %197 = vmatpush.msra.mxu2 %v180_v26  ;;  %v91_v37 = vld [vmem:[#allocation5 + $0x98] sm:$0xff]  ;;  %v174_v38 = vld [vmem:[#allocation7 + $0x90] sm:$0xff] }
  0x1c   :  { %114 = vmatpush.msra.mxu0 %v81_v12  ;;  %220 = vmatpush.msra.mxu3 %v181_v27  ;;  %v176_v34 = vld [vmem:[#allocation7 + $0xa0] sm:$0xff]  ;;  %v175_v39 = vld [vmem:[#allocation7 + $0x98] sm:$0xff]  ;;  %v74_v40 = vld [vmem:[#allocation5 + $0x10] sm:$0xff] }
  0x1d   :  { %137 = vmatpush.msra.mxu1 %v97_v13  ;;  %198 = vmatpush.msra.mxu2 %v178_v30  ;;  %v90_v41 = vld [vmem:[#allocation5 + $0x90] sm:$0xff]  ;;  %v172_v42 = vld [vmem:[#allocation7 + $0x80] sm:$0xff]  ;;  %v173_v43 = vld [vmem:[#allocation7 + $0x88] sm:$0xff] }
  0x1e   :  { %115 = vmatpush.msra.mxu0 %v80_v14  ;;  %221 = vmatpush.msra.mxu3 %v179_v31  ;;  %v73_v44 = vld [vmem:[#allocation5 + $0x8] sm:$0xff]  ;;  %v170_v46 = vld [vmem:[#allocation7 + $0x70] sm:$0xff]  ;;  %v171_v47 = vld [vmem:[#allocation7 + $0x78] sm:$0xff] }
  0x1f   :  { %138 = vmatpush.msra.mxu1 %v96_v15  ;;  %199 = vmatpush.msra.mxu2 %v176_v34  ;;  %v89_v45 = vld [vmem:[#allocation5 + $0x88] sm:$0xff]  ;;  %v72_v48 = vld [vmem:[#allocation5] sm:$0xff]  ;;  %v166_v54 = vld [vmem:[#allocation7 + $0x50] sm:$0xff] }
  0x20   :  { %116 = vmatpush.msra.mxu0 %v79_v20  ;;  %222 = vmatpush.msra.mxu3 %v177_v35  ;;  %v88_v49 = vld [vmem:[#allocation5 + $0x80] sm:$0xff]  ;;  %v69_v51 = vld [vmem:[#allocation2 + $0x8] sm:$0xff]  ;;  %v167_v55 = vld [vmem:[#allocation7 + $0x58] sm:$0xff] }
  0x21   :  { %139 = vmatpush.msra.mxu1 %v95_v21  ;;  %200 = vmatpush.msra.mxu2 %v174_v38  ;;  %v68_v50 = vld [vmem:[#allocation2] sm:$0xff]  ;;  %v169_v53 = vld [vmem:[#allocation7 + $0x68] sm:$0xff]  ;;  %v70_v58 = vld [vmem:[#allocation2 + $0x10] sm:$0xff] }
  0x22   :  { %117 = vmatpush.msra.mxu0 %v78_v24  ;;  %223 = vmatpush.msra.mxu3 %v175_v39  ;;  %v168_v52 = vld [vmem:[#allocation7 + $0x60] sm:$0xff]  ;;  %v165_v57 = vld [vmem:[#allocation7 + $0x48] sm:$0xff]  ;;  %v71_v59 = vld [vmem:[#allocation2 + $0x18] sm:$0xff] }
  0x23   :  { %140 = vmatpush.msra.mxu1 %v94_v25  ;;  %201 = vmatpush.msra.mxu2 %v172_v42  ;;  %v164_v56 = vld [vmem:[#allocation7 + $0x40] sm:$0xff]  ;;  %v162_v60 = vld [vmem:[#allocation7 + $0x30] sm:$0xff]  ;;  %v163_v61 = vld [vmem:[#allocation7 + $0x38] sm:$0xff] }
  0x24   :  { %118 = vmatpush.msra.mxu0 %v77_v28  ;;  %224 = vmatpush.msra.mxu3 %v173_v43  ;;  %v160_v62 = vld [vmem:[#allocation7 + $0x20] sm:$0xff]  ;;  %v161_v63 = vld [vmem:[#allocation7 + $0x28] sm:$0xff]  ;;  %v158_v0 = vld [vmem:[#allocation7 + $0x10] sm:$0xff] }
  0x25   :  { %141 = vmatpush.msra.mxu1 %v93_v29  ;;  %202 = vmatpush.msra.mxu2 %v170_v46  ;;  %v159_v1 = vld [vmem:[#allocation7 + $0x18] sm:$0xff]  ;;  %v156_v2 = vld [vmem:[#allocation7] sm:$0xff]  ;;  %v157_v3 = vld [vmem:[#allocation7 + $0x8] sm:$0xff] }
  0x26   :  { %119 = vmatpush.msra.mxu0 %v76_v32  ;;  %225 = vmatpush.msra.mxu3 %v171_v47  ;;  %v272_v4 = vld [vmem:[%s442_s2] ss:$0 sm:$0xff]  ;;  %s382_s2 = smov [#allocation8]  }
  0x27   :  { %142 = vmatpush.msra.mxu1 %v92_v33  ;;  %203 = vmatpush.msra.mxu2 %v168_v52  ;;  %v188_v15 = vld [vmem:[%s444_s4] sm:$0x3]  ;;  %s248_s13 = sshll.u32 %s382_s2, 4  ;;  %s249_s13 = int_to_ptr.vmem [resolvable:$true] %s248_s13 }
  0x28   :  { %120 = vmatpush.msra.mxu0 %v75_v36  ;;  %226 = vmatpush.msra.mxu3 %v169_v53  ;;  %v190_v16 = vperm.slane %v188_v15, 0  ;;  %v191_v17 = vperm.slane %v188_v15, 1 }
  0x29   :  { %143 = vmatpush.msra.mxu1 %v91_v37  ;;  %204 = vmatpush.msra.mxu2 %v166_v54 }
  0x2a   :  { %121 = vmatpush.msra.mxu0 %v74_v40  ;;  %227 = vmatpush.msra.mxu3 %v167_v55 }
  0x2b   :  { %144 = vmatpush.msra.mxu1 %v90_v41  ;;  %205 = vmatpush.msra.mxu2 %v164_v56 }
  0x2c   :  { %122 = vmatpush.msra.mxu0 %v73_v44  ;;  %228 = vmatpush.msra.mxu3 %v165_v57 }
  0x2d   :  { %145 = vmatpush.msra.mxu1 %v89_v45  ;;  %206 = vmatpush.msra.mxu2 %v162_v60 }
  0x2e   :  { %123 = vmatpush.msra.mxu0 %v72_v48  ;;  %229 = vmatpush.msra.mxu3 %v163_v61 }
  0x2f   :  { %146 = vmatpush.msra.mxu1 %v88_v49  ;;  %124 = vmatmul.f32.vlgmr.msra.gmra.mxu0 %v68_v50 }
  0x30   :  { %147 = vmatmul.f32.vlgmr.msra.gmra.mxu1 %v69_v51  ;;  %207 = vmatpush.msra.mxu2 %v160_v62 }
  0x31   :  { %230 = vmatpush.msra.mxu3 %v161_v63 }
  0x32   :  { %208 = vmatpush.msra.mxu2 %v158_v0 }
  0x33   :  { %231 = vmatpush.msra.mxu3 %v159_v1 }
  0x34   :  { %209 = vmatpush.msra.mxu2 %v156_v2 }
  0x35   :  { %232 = vmatpush.msra.mxu3 %v157_v3 }
  0x37   :  { %127 = vmatmul.f32.gmra.mxu0 %v70_v58 }
  0x38   :  { %150 = vmatmul.f32.gmra.mxu1 %v71_v59 }
  0xac   :  { %v125_v5 = vpop.f32.mrf.mxu0 }
  0xad   :  { %v148_v6 = vpop.f32.mrf.mxu1  ;;  %v126_v7 = vadd.f32 %v272_v4, %v125_v5 }
  0xaf   :  { %v149_v8 = vadd.f32 %v148_v6, %v126_v7 }
  0xb1   :  { %v154_v9 = vmax.f32 %v149_v8, 0.0 }
  0xb3   :  { %210 = vmatmul.f32.vlgmr.msra.gmra.mxu2 %v154_v9  ;;  %233 = vmatmul.f32.vlgmr.msra.gmra.mxu3 %v154_v9 }
  0xb4   :  { %v128_v10 = vpop.f32.mrf.mxu0 }
  0xb5   :  { %v151_v11 = vpop.f32.mrf.mxu1  ;;  %v129_v12 = vadd.f32 %v272_v4, %v128_v10 }
  0xb7   :  { %v152_v13 = vadd.f32 %v151_v11, %v129_v12 }
  0xb9   :  { %v155_v14 = vmax.f32 %v152_v13, 0.0 }
  0xbb   :  { %213 = vmatmul.f32.gmra.mxu2 %v155_v14  ;;  %236 = vmatmul.f32.gmra.mxu3 %v155_v14 }
 0x136   :  { %v211_v18 = vpop.f32.mrf.mxu2  ;;  %v234_v19 = vpop.f32.mrf.mxu3 }
 0x137   :  { %v212_v20 = vadd.f32 %v211_v18, %v190_v16  ;;  %v235_v21 = vadd.f32 %v234_v19, %v191_v17 }
 0x139   :  { %240 = vst [vmem:[#allocation8] sm:$0xff] %v212_v20 }
 0x13a   :  { %241 = vst [vmem:[#allocation8 + $0x8] sm:$0xff] %v235_v21 }
 0x13e   :  { %v214_v22 = vpop.f32.mrf.mxu2  ;;  %v237_v23 = vpop.f32.mrf.mxu3 }
 0x13f   :  { %v215_v24 = vadd.f32 %v214_v22, %v190_v16  ;;  %v238_v25 = vadd.f32 %v237_v23, %v191_v17 }
 0x141   :  { %242 = vst [vmem:[#allocation8 + $0x10] sm:$0xff] %v215_v24 }
 0x142   :  { %243 = vst [vmem:[#allocation8 + $0x18] sm:$0xff] %v238_v25 }
 0x143   :  { %256 = dma.vmem_to_hbm [thread:$0]  %s249_s13, 512, %s251_s16, [#allocation4], %s379_s30, %s379_s30, %s380_s6  }
 0x144   :  { %373 = dma.done.wait [#allocation4], 512  }
 0x145   :  { %374 = vsyncadd [#allocation4], 4294966784 }
 0x146   :  { %261 = vsyncpa [#allocation3], 1 }
 0x147   :  { %262 = vsyncpa [#allocation6], 1 }
 0x148   :  { %263 = vsyncpa [#allocation4], 1 }

</bundles_post_ra>
